<compile_context>
chip_gen: v5e
topology: v5e:2x2
jax: 0.10.0
libtpu: 0.0.40
codegen_flags: <defaults>
</compile_context>

<pallas_src>
import jax
import jax.numpy as jnp
from jax.experimental import pallas as pl
from jax.experimental.pallas import tpu as pltpu


# ----------------------------------------------------------------------------
# Graph schema
# ----------------------------------------------------------------------------
CANONICAL_ETYPES = [
    ("protein", "ppi", "protein"),
    ("drug", "dpi", "protein"),
    ("protein", "pdi", "drug"),
    ("drug", "ddi_0", "drug"),
    ("drug", "ddi_1", "drug"),
]
DDI_ETYPES = ["ddi_0", "ddi_1"]


# ----------------------------------------------------------------------------
# Helpers
# ----------------------------------------------------------------------------
def _full_spec(shape):
    nd = len(shape)
    return pl.BlockSpec(shape, lambda *_: (0,) * nd)


_COMPILER_PARAMS = pltpu.CompilerParams(vmem_limit_bytes=16 * 1024 * 1024)


def build_anorm(src_idx, dst_idx, n_src, n_dst):
    """Row-normalized incidence so A @ h == per-dst mean of src messages (0 if deg=0)."""
    adj = jnp.zeros((n_dst, n_src), jnp.float32).at[dst_idx, src_idx].add(1.0)
    deg = adj.sum(axis=1, keepdims=True)
    return adj / jnp.maximum(deg, 1.0)


# ----------------------------------------------------------------------------
# Pallas kernels
# ----------------------------------------------------------------------------
def _encoder_kernel(drug_emb_ref, prot_feat_ref, pf_wt_ref, pf_b_ref,
                    wdp_ref, bdp_ref, wpp_ref, bpp_ref,
                    a_ppi_ref, a_dpi_ref, a_pdi_ref, a_ddi0_ref, a_ddi1_ref,
                    dec_wd_ref, dec_wp_ref, cse0_ref, cse1_ref,
                    drug_pack_ref, prot_pack_ref):
    f32 = jnp.float32
    D = dec_wp_ref.shape[0]

    # --- input projections (pre-conv node states) ---
    drug_h0 = drug_emb_ref[...]                                         # identity embedding
    prot_h0 = jnp.dot(prot_feat_ref[...], pf_wt_ref[...],
                      preferred_element_type=f32) + pf_b_ref[...]

    # --- conv + self-loop projections: ONE matmul per source ntype ---
    # drug   : [dpi | ddi_0 | ddi_1 | self]  -> [n_drug, 4D]
    # protein: [ppi | pdi | self]            -> [n_prot, 3D]
    drug_proj = jnp.dot(drug_h0, wdp_ref[...], preferred_element_type=f32) + bdp_ref[...]
    prot_proj = jnp.dot(prot_h0, wpp_ref[...], preferred_element_type=f32) + bpp_ref[...]

    h_dpi = drug_proj[:, 0 * D:1 * D]
    h_ddi0 = drug_proj[:, 1 * D:2 * D]
    h_ddi1 = drug_proj[:, 2 * D:3 * D]
    drug_self = drug_proj[:, 3 * D:4 * D]
    h_ppi = prot_proj[:, 0 * D:1 * D]
    h_pdi = prot_proj[:, 1 * D:2 * D]
    prot_self = prot_proj[:, 2 * D:3 * D]

    # --- per-dst mean aggregation (dense row-normalized adjacency) + cross-etype mean ---
    neigh_prot = (jnp.dot(a_ppi_ref[...], h_ppi, preferred_element_type=f32)
                  + jnp.dot(a_dpi_ref[...], h_dpi, preferred_element_type=f32)) * 0.5
    neigh_drug = (jnp.dot(a_pdi_ref[...], h_pdi, preferred_element_type=f32)
                  + jnp.dot(a_ddi0_ref[...], h_ddi0, preferred_element_type=f32)
                  + jnp.dot(a_ddi1_ref[...], h_ddi1, preferred_element_type=f32)) * (1.0 / 3.0)

    # --- self-loop + neighbor add + encoder relu ---
    drug_h = jnp.maximum(drug_self + neigh_drug, 0.0)
    prot_h = jnp.maximum(prot_self + neigh_prot, 0.0)

    # --- decoder node-level weight applications (per node, NOT per edge) ---
    # dec_wd = [W_dpi^T | cse0^T ⊙ W_ddi^T | cse1^T ⊙ W_ddi^T]  -> one [n_drug, 3D] matmul
    # dec_wp = W_ppi^T                                          -> one [n_prot, D]  matmul
    drug_dec = jnp.dot(drug_h, dec_wd_ref[...], preferred_element_type=f32)
    prot_ppi = jnp.dot(prot_h, dec_wp_ref[...], preferred_element_type=f32)
    drug_s0 = drug_h * cse0_ref[...]       # ddi dst-side cse scaling
    drug_s1 = drug_h * cse1_ref[...]

    # packed output slabs (single wide store per ntype)
    drug_pack_ref[...] = jnp.concatenate([drug_h, drug_dec, drug_s0, drug_s1], axis=1)
    prot_pack_ref[...] = jnp.concatenate([prot_h, prot_ppi], axis=1)


def _decoder_kernel(aT_ref, bT_ref, o_ref):
    # aT : [D, E_pad]  weighted-src features (column e = W_g-projected src of edge e)
    # bT : [D, E_pad]  partner features     (column e = dst / partner of edge e)
    # score_e = <a_e, b_e>  -> lane-dense (1, E_pad) output; no matmul needed.
    o_ref[...] = jnp.sum(aT_ref[...] * bT_ref[...], axis=0, keepdims=True)


# ----------------------------------------------------------------------------
# One-time parameter preparation (transposes / reshapes / concatenations hoisted)
# ----------------------------------------------------------------------------
def prepare_params(p):
    D = p["self_w_drug"].shape[0]
    cse0 = p["cse_ddi_0"].reshape(1, D)
    cse1 = p["cse_ddi_1"].reshape(1, D)
    return {
        "drug_emb": p["drug_identity_emb"],
        "pf_wt": p["prot_feat_w"].T,
        "pf_b": p["prot_feat_b"].reshape(1, -1),
        # conv + self-loop projections concatenated along the output dim, per source ntype
        "w_drug_proj": jnp.concatenate([p["conv_w_dpi"].T, p["conv_w_ddi_0"].T,
                                        p["conv_w_ddi_1"].T, p["self_w_drug"].T], axis=1),
        "b_drug_proj": jnp.concatenate([p["conv_b_dpi"], p["conv_b_ddi_0"],
                                        p["conv_b_ddi_1"], p["self_b_drug"]]).reshape(1, -1),
        "w_prot_proj": jnp.concatenate([p["conv_w_ppi"].T, p["conv_w_pdi"].T,
                                        p["self_w_protein"].T], axis=1),
        "b_prot_proj": jnp.concatenate([p["conv_b_ppi"], p["conv_b_pdi"],
                                        p["self_b_protein"]]).reshape(1, -1),
        # decoder node-level weights.  (c ⊙ x) @ W^T == x @ (c^T ⊙ W^T), so the ddi CSE
        # scaling is folded into the weight as a row scale (src side); dst side keeps cse.
        "dec_w_drug": jnp.concatenate([p["dpi_w"].T,
                                       cse0.T * p["ddi_w"].T,
                                       cse1.T * p["ddi_w"].T], axis=1),   # [D, 3D]
        "dec_w_prot": p["ppi_w"].T,                                       # [D, D]
        "cse_0": cse0,
        "cse_1": cse1,
    }


# ----------------------------------------------------------------------------
# Forward pass
# ----------------------------------------------------------------------------
def encoder_forward(prep, pos_edges, prot_feat):
    n_drug = prep["drug_emb"].shape[0]
    n_prot = prot_feat.shape[0]
    D = prep["dec_w_prot"].shape[0]

    # TODO(synk): at real Decagon scale (~19k proteins) the dense O(N^2) A_norm must be
    # replaced by a PrefetchScalarGridSpec segment-mean gather kernel; dense is fine here.
    s, d = pos_edges["ppi"];   a_ppi = build_anorm(s, d, n_prot, n_prot)
    s, d = pos_edges["dpi"];   a_dpi = build_anorm(s, d, n_drug, n_prot)
    s, d = pos_edges["pdi"];   a_pdi = build_anorm(s, d, n_prot, n_drug)
    s, d = pos_edges["ddi_0"]; a_ddi0 = build_anorm(s, d, n_drug, n_drug)
    s, d = pos_edges["ddi_1"]; a_ddi1 = build_anorm(s, d, n_drug, n_drug)

    ins = [prep["drug_emb"], prot_feat, prep["pf_wt"], prep["pf_b"],
           prep["w_drug_proj"], prep["b_drug_proj"],
           prep["w_prot_proj"], prep["b_prot_proj"],
           a_ppi, a_dpi, a_pdi, a_ddi0, a_ddi1,
           prep["dec_w_drug"], prep["dec_w_prot"], prep["cse_0"], prep["cse_1"]]

    drug_pack, prot_pack = pl.pallas_call(
        _encoder_kernel,
        out_shape=(jax.ShapeDtypeStruct((n_drug, 6 * D), jnp.float32),
                   jax.ShapeDtypeStruct((n_prot, 2 * D), jnp.float32)),
        in_specs=[_full_spec(x.shape) for x in ins],
        out_specs=(_full_spec((n_drug, 6 * D)), _full_spec((n_prot, 2 * D))),
        compiler_params=_COMPILER_PARAMS,
    )(*ins)

    return {
        "drug_h": drug_pack[:, 0 * D:1 * D],
        "drug_w_dpi": drug_pack[:, 1 * D:2 * D],     # W_dpi h_drug
        "drug_s0w": drug_pack[:, 2 * D:3 * D],       # W_ddi (cse0 ⊙ h_drug)
        "drug_s1w": drug_pack[:, 3 * D:4 * D],       # W_ddi (cse1 ⊙ h_drug)
        "drug_s0": drug_pack[:, 4 * D:5 * D],        # cse0 ⊙ h_drug
        "drug_s1": drug_pack[:, 5 * D:6 * D],        # cse1 ⊙ h_drug
        "prot_h": prot_pack[:, 0 * D:1 * D],
        "prot_w_ppi": prot_pack[:, 1 * D:2 * D],     # W_ppi h_prot
    }


def decoder_forward_fused(prep, h, pos_edges, neg_edges):
    D = prep["dec_w_prot"].shape[0]

    # (canonical_etype, pos/neg, weighted_src_rows, partner_rows)
    entries = []
    for which, edges in (("pos", pos_edges), ("neg", neg_edges)):
        s, d = edges["ppi"]
        entries.append((("protein", "ppi", "protein"), which,
                        h["prot_w_ppi"][s], h["prot_h"][d]))
        s, d = edges["dpi"]
        entries.append((("drug", "dpi", "protein"), which,
                        h["drug_w_dpi"][s], h["prot_h"][d]))
        s, d = edges["pdi"]
        # pdi: <h_prot[src], W_dpi h_drug[dst]>  -> drug side carries the weight (dot symmetric)
        entries.append((("protein", "pdi", "drug"), which,
                        h["drug_w_dpi"][d], h["prot_h"][s]))
        s, d = edges["ddi_0"]
        entries.append((("drug", "ddi_0", "drug"), which,
                        h["drug_s0w"][s], h["drug_s0"][d]))
        s, d = edges["ddi_1"]
        entries.append((("drug", "ddi_1", "drug"), which,
                        h["drug_s1w"][s], h["drug_s1"][d]))

    counts = [a.shape[0] for (_, _, a, _) in entries]
    total = sum(counts)
    e_pad = max(128, ((total + 127) // 128) * 128)   # lane-dense packed score output

    a_cat = jnp.concatenate([a for (_, _, a, _) in entries], axis=0)
    b_cat = jnp.concatenate([b for (_, _, _, b) in entries], axis=0)
    a_t = jnp.pad(a_cat, ((0, e_pad - total), (0, 0))).T        # [D, E_pad]
    b_t = jnp.pad(b_cat, ((0, e_pad - total), (0, 0))).T        # [D, E_pad]

    scores = pl.pallas_call(
        _decoder_kernel,
        out_shape=jax.ShapeDtypeStruct((1, e_pad), jnp.float32),
        in_specs=[_full_spec((D, e_pad)), _full_spec((D, e_pad))],
        out_specs=_full_spec((1, e_pad)),
        compiler_params=_COMPILER_PARAMS,
    )(a_t, b_t)[0]

    pos_scores, neg_scores = {}, {}
    off = 0
    for (key, which, _, _), e in zip(entries, counts):
        (pos_scores if which == "pos" else neg_scores)[key] = scores[off:off + e]
        off += e
    return pos_scores, neg_scores


@jax.jit
def link_predictor_forward(prep, pos_edges, neg_edges, prot_feat):
    ntype2h = encoder_forward(prep, pos_edges, prot_feat)
    return decoder_forward_fused(prep, ntype2h, pos_edges, neg_edges)


# ----------------------------------------------------------------------------
# Deterministic parameter / graph construction and driver
# ----------------------------------------------------------------------------
def make_params(key, d, prot_feat_dim, n_drug):
    ks = iter(jax.random.split(key, 32))

    def lin(kw, kb, out_dim, in_dim):
        lim = 1.0 / jnp.sqrt(jnp.float32(in_dim))
        w = jax.random.uniform(kw, (out_dim, in_dim), jnp.float32, -lim, lim)
        b = jax.random.uniform(kb, (out_dim,), jnp.float32, -lim, lim)
        return w, b

    params = {}
    params["drug_identity_emb"] = jax.random.normal(next(ks), (n_drug, d), jnp.float32)
    params["prot_feat_w"], params["prot_feat_b"] = lin(next(ks), next(ks), d, prot_feat_dim)
    for (_, et, _) in CANONICAL_ETYPES:
        params[f"conv_w_{et}"], params[f"conv_b_{et}"] = lin(next(ks), next(ks), d, d)
    for ntype in ("drug", "protein"):
        params[f"self_w_{ntype}"], params[f"self_b_{ntype}"] = lin(next(ks), next(ks), d, d)
    params["ppi_w"] = jax.random.uniform(next(ks), (d, d), jnp.float32, -0.3, 0.3)
    params["ddi_w"] = jax.random.uniform(next(ks), (d, d), jnp.float32, -0.3, 0.3)
    params["dpi_w"] = jax.random.uniform(next(ks), (d, d), jnp.float32, -0.3, 0.3)
    for et in DDI_ETYPES:
        params[f"cse_{et}"] = jax.random.uniform(next(ks), (1, d), jnp.float32, -0.5, 0.5)
    return params


def make_edges(key, n_drug, n_prot):
    ks = iter(jax.random.split(key, 16))

    def edge(k, n_src, n_dst, n_edges):
        k1, k2 = jax.random.split(k)
        s = jax.random.randint(k1, (n_edges,), 0, n_src, jnp.int32)
        d = jax.random.randint(k2, (n_edges,), 0, n_dst, jnp.int32)
        return s, d

    return {
        "ppi": edge(next(ks), n_prot, n_prot, 10),
        "dpi": edge(next(ks), n_drug, n_prot, 8),
        "pdi": edge(next(ks), n_prot, n_drug, 8),
        "ddi_0": edge(next(ks), n_drug, n_drug, 6),
        "ddi_1": edge(next(ks), n_drug, n_drug, 6),
    }


if __name__ == "__main__":
    N_DRUG, N_PROT = 12, 16
    PROT_FEAT_DIM = 24
    D = 32  # dims = [32, 32] -> one HeteroRGCN layer; dropout treated as eval-mode identity

    root = jax.random.PRNGKey(0)
    k_params, k_pos, k_neg, k_feat = jax.random.split(root, 4)

    raw_params = make_params(k_params, D, PROT_FEAT_DIM, N_DRUG)
    prep = prepare_params(raw_params)
    pos_edges = make_edges(k_pos, N_DRUG, N_PROT)
    neg_edges = make_edges(k_neg, N_DRUG, N_PROT)
    prot_feat = jax.random.normal(k_feat, (N_PROT, PROT_FEAT_DIM), jnp.float32)

    pos_scores, neg_scores = link_predictor_forward(prep, pos_edges, neg_edges, prot_feat)
    jax.block_until_ready((pos_scores, neg_scores))
    print("KERNEL_OK")
</pallas_src>

<mosaic_0001>
module attributes {stable_mosaic.version = 11 : i64} {
  func.func @_encoder_kernel(%arg0: memref<12x32xf32, #tpu.memory_space<vmem>>, %arg1: memref<16x24xf32, #tpu.memory_space<vmem>>, %arg2: memref<24x32xf32, #tpu.memory_space<vmem>>, %arg3: memref<1x32xf32, #tpu.memory_space<vmem>>, %arg4: memref<32x128xf32, #tpu.memory_space<vmem>>, %arg5: memref<1x128xf32, #tpu.memory_space<vmem>>, %arg6: memref<32x96xf32, #tpu.memory_space<vmem>>, %arg7: memref<1x96xf32, #tpu.memory_space<vmem>>, %arg8: memref<16x16xf32, #tpu.memory_space<vmem>>, %arg9: memref<16x12xf32, #tpu.memory_space<vmem>>, %arg10: memref<12x16xf32, #tpu.memory_space<vmem>>, %arg11: memref<12x12xf32, #tpu.memory_space<vmem>>, %arg12: memref<12x12xf32, #tpu.memory_space<vmem>>, %arg13: memref<32x96xf32, #tpu.memory_space<vmem>>, %arg14: memref<32x32xf32, #tpu.memory_space<vmem>>, %arg15: memref<1x32xf32, #tpu.memory_space<vmem>>, %arg16: memref<1x32xf32, #tpu.memory_space<vmem>>, %arg17: memref<12x192xf32, #tpu.memory_space<vmem>>, %arg18: memref<16x64xf32, #tpu.memory_space<vmem>>) attributes {dimension_semantics = [], scalar_prefetch = 0 : i64, scratch_operands = 0 : i64, tpu.core_type = #tpu.core_type<tc>} {
    %c0 = arith.constant 0 : index
    %c0_0 = arith.constant 0 : index
    %0 = vector.load %arg0[%c0, %c0_0] : memref<12x32xf32, #tpu.memory_space<vmem>>, vector<12x32xf32>
    %c0_1 = arith.constant 0 : index
    %c0_2 = arith.constant 0 : index
    %1 = vector.load %arg1[%c0_1, %c0_2] : memref<16x24xf32, #tpu.memory_space<vmem>>, vector<16x24xf32>
    %c0_3 = arith.constant 0 : index
    %c0_4 = arith.constant 0 : index
    %2 = vector.load %arg2[%c0_3, %c0_4] : memref<24x32xf32, #tpu.memory_space<vmem>>, vector<24x32xf32>
    %cst = arith.constant dense<0.000000e+00> : vector<16x32xf32>
    %3 = tpu.matmul %1, %2, %cst {dimension_numbers = #tpu.dot_dimension_numbers<[1], [0], [0], [1], [0, 0, 1, 1], [], []>} : vector<16x24xf32>, vector<24x32xf32>, vector<16x32xf32> -> vector<16x32xf32>
    %c0_5 = arith.constant 0 : index
    %c0_6 = arith.constant 0 : index
    %4 = vector.load %arg3[%c0_5, %c0_6] : memref<1x32xf32, #tpu.memory_space<vmem>>, vector<1x32xf32>
    %5 = vector.broadcast %4 : vector<1x32xf32> to vector<16x32xf32>
    %6 = arith.addf %3, %5 : vector<16x32xf32>
    %c0_7 = arith.constant 0 : index
    %c0_8 = arith.constant 0 : index
    %7 = vector.load %arg4[%c0_7, %c0_8] : memref<32x128xf32, #tpu.memory_space<vmem>>, vector<32x128xf32>
    %cst_9 = arith.constant dense<0.000000e+00> : vector<12x128xf32>
    %8 = tpu.matmul %0, %7, %cst_9 {dimension_numbers = #tpu.dot_dimension_numbers<[1], [0], [0], [1], [0, 0, 1, 1], [], []>} : vector<12x32xf32>, vector<32x128xf32>, vector<12x128xf32> -> vector<12x128xf32>
    %c0_10 = arith.constant 0 : index
    %c0_11 = arith.constant 0 : index
    %9 = vector.load %arg5[%c0_10, %c0_11] : memref<1x128xf32, #tpu.memory_space<vmem>>, vector<1x128xf32>
    %10 = vector.broadcast %9 : vector<1x128xf32> to vector<12x128xf32>
    %11 = arith.addf %8, %10 : vector<12x128xf32>
    %c0_12 = arith.constant 0 : index
    %c0_13 = arith.constant 0 : index
    %12 = vector.load %arg6[%c0_12, %c0_13] : memref<32x96xf32, #tpu.memory_space<vmem>>, vector<32x96xf32>
    %cst_14 = arith.constant dense<0.000000e+00> : vector<16x96xf32>
    %13 = tpu.matmul %6, %12, %cst_14 {dimension_numbers = #tpu.dot_dimension_numbers<[1], [0], [0], [1], [0, 0, 1, 1], [], []>} : vector<16x32xf32>, vector<32x96xf32>, vector<16x96xf32> -> vector<16x96xf32>
    %c0_15 = arith.constant 0 : index
    %c0_16 = arith.constant 0 : index
    %14 = vector.load %arg7[%c0_15, %c0_16] : memref<1x96xf32, #tpu.memory_space<vmem>>, vector<1x96xf32>
    %15 = vector.broadcast %14 : vector<1x96xf32> to vector<16x96xf32>
    %16 = arith.addf %13, %15 : vector<16x96xf32>
    %17 = vector.extract_strided_slice %11 {offsets = [0, 0], sizes = [12, 32], strides = [1, 1]} : vector<12x128xf32> to vector<12x32xf32>
    %18 = vector.extract_strided_slice %11 {offsets = [0, 32], sizes = [12, 32], strides = [1, 1]} : vector<12x128xf32> to vector<12x32xf32>
    %19 = vector.extract_strided_slice %11 {offsets = [0, 64], sizes = [12, 32], strides = [1, 1]} : vector<12x128xf32> to vector<12x32xf32>
    %20 = vector.extract_strided_slice %11 {offsets = [0, 96], sizes = [12, 32], strides = [1, 1]} : vector<12x128xf32> to vector<12x32xf32>
    %21 = vector.extract_strided_slice %16 {offsets = [0, 0], sizes = [16, 32], strides = [1, 1]} : vector<16x96xf32> to vector<16x32xf32>
    %22 = vector.extract_strided_slice %16 {offsets = [0, 32], sizes = [16, 32], strides = [1, 1]} : vector<16x96xf32> to vector<16x32xf32>
    %23 = vector.extract_strided_slice %16 {offsets = [0, 64], sizes = [16, 32], strides = [1, 1]} : vector<16x96xf32> to vector<16x32xf32>
    %c0_17 = arith.constant 0 : index
    %c0_18 = arith.constant 0 : index
    %24 = vector.load %arg8[%c0_17, %c0_18] : memref<16x16xf32, #tpu.memory_space<vmem>>, vector<16x16xf32>
    %cst_19 = arith.constant dense<0.000000e+00> : vector<16x32xf32>
    %25 = tpu.matmul %24, %21, %cst_19 {dimension_numbers = #tpu.dot_dimension_numbers<[1], [0], [0], [1], [0, 0, 1, 1], [], []>} : vector<16x16xf32>, vector<16x32xf32>, vector<16x32xf32> -> vector<16x32xf32>
    %c0_20 = arith.constant 0 : index
    %c0_21 = arith.constant 0 : index
    %26 = vector.load %arg9[%c0_20, %c0_21] : memref<16x12xf32, #tpu.memory_space<vmem>>, vector<16x12xf32>
    %cst_22 = arith.constant dense<0.000000e+00> : vector<16x32xf32>
    %27 = tpu.matmul %26, %17, %cst_22 {dimension_numbers = #tpu.dot_dimension_numbers<[1], [0], [0], [1], [0, 0, 1, 1], [], []>} : vector<16x12xf32>, vector<12x32xf32>, vector<16x32xf32> -> vector<16x32xf32>
    %28 = arith.addf %25, %27 : vector<16x32xf32>
    %cst_23 = arith.constant 5.000000e-01 : f32
    %29 = vector.broadcast %cst_23 : f32 to vector<16x32xf32>
    %30 = arith.mulf %28, %29 : vector<16x32xf32>
    %c0_24 = arith.constant 0 : index
    %c0_25 = arith.constant 0 : index
    %31 = vector.load %arg10[%c0_24, %c0_25] : memref<12x16xf32, #tpu.memory_space<vmem>>, vector<12x16xf32>
    %cst_26 = arith.constant dense<0.000000e+00> : vector<12x32xf32>
    %32 = tpu.matmul %31, %22, %cst_26 {dimension_numbers = #tpu.dot_dimension_numbers<[1], [0], [0], [1], [0, 0, 1, 1], [], []>} : vector<12x16xf32>, vector<16x32xf32>, vector<12x32xf32> -> vector<12x32xf32>
    %c0_27 = arith.constant 0 : index
    %c0_28 = arith.constant 0 : index
    %33 = vector.load %arg11[%c0_27, %c0_28] : memref<12x12xf32, #tpu.memory_space<vmem>>, vector<12x12xf32>
    %cst_29 = arith.constant dense<0.000000e+00> : vector<12x32xf32>
    %34 = tpu.matmul %33, %18, %cst_29 {dimension_numbers = #tpu.dot_dimension_numbers<[1], [0], [0], [1], [0, 0, 1, 1], [], []>} : vector<12x12xf32>, vector<12x32xf32>, vector<12x32xf32> -> vector<12x32xf32>
    %35 = arith.addf %32, %34 : vector<12x32xf32>
    %c0_30 = arith.constant 0 : index
    %c0_31 = arith.constant 0 : index
    %36 = vector.load %arg12[%c0_30, %c0_31] : memref<12x12xf32, #tpu.memory_space<vmem>>, vector<12x12xf32>
    %cst_32 = arith.constant dense<0.000000e+00> : vector<12x32xf32>
    %37 = tpu.matmul %36, %19, %cst_32 {dimension_numbers = #tpu.dot_dimension_numbers<[1], [0], [0], [1], [0, 0, 1, 1], [], []>} : vector<12x12xf32>, vector<12x32xf32>, vector<12x32xf32> -> vector<12x32xf32>
    %38 = arith.addf %35, %37 : vector<12x32xf32>
    %cst_33 = arith.constant 0.333333343 : f32
    %39 = vector.broadcast %cst_33 : f32 to vector<12x32xf32>
    %40 = arith.mulf %38, %39 : vector<12x32xf32>
    %41 = arith.addf %20, %40 : vector<12x32xf32>
    %cst_34 = arith.constant 0.000000e+00 : f32
    %42 = vector.broadcast %cst_34 : f32 to vector<12x32xf32>
    %43 = arith.maximumf %41, %42 : vector<12x32xf32>
    %44 = arith.addf %23, %30 : vector<16x32xf32>
    %cst_35 = arith.constant 0.000000e+00 : f32
    %45 = vector.broadcast %cst_35 : f32 to vector<16x32xf32>
    %46 = arith.maximumf %44, %45 : vector<16x32xf32>
    %c0_36 = arith.constant 0 : index
    %c0_37 = arith.constant 0 : index
    %47 = vector.load %arg13[%c0_36, %c0_37] : memref<32x96xf32, #tpu.memory_space<vmem>>, vector<32x96xf32>
    %cst_38 = arith.constant dense<0.000000e+00> : vector<12x96xf32>
    %48 = tpu.matmul %43, %47, %cst_38 {dimension_numbers = #tpu.dot_dimension_numbers<[1], [0], [0], [1], [0, 0, 1, 1], [], []>} : vector<12x32xf32>, vector<32x96xf32>, vector<12x96xf32> -> vector<12x96xf32>
    %c0_39 = arith.constant 0 : index
    %c0_40 = arith.constant 0 : index
    %49 = vector.load %arg14[%c0_39, %c0_40] : memref<32x32xf32, #tpu.memory_space<vmem>>, vector<32x32xf32>
    %cst_41 = arith.constant dense<0.000000e+00> : vector<16x32xf32>
    %50 = tpu.matmul %46, %49, %cst_41 {dimension_numbers = #tpu.dot_dimension_numbers<[1], [0], [0], [1], [0, 0, 1, 1], [], []>} : vector<16x32xf32>, vector<32x32xf32>, vector<16x32xf32> -> vector<16x32xf32>
    %c0_42 = arith.constant 0 : index
    %c0_43 = arith.constant 0 : index
    %51 = vector.load %arg15[%c0_42, %c0_43] : memref<1x32xf32, #tpu.memory_space<vmem>>, vector<1x32xf32>
    %52 = vector.broadcast %51 : vector<1x32xf32> to vector<12x32xf32>
    %53 = arith.mulf %43, %52 : vector<12x32xf32>
    %c0_44 = arith.constant 0 : index
    %c0_45 = arith.constant 0 : index
    %54 = vector.load %arg16[%c0_44, %c0_45] : memref<1x32xf32, #tpu.memory_space<vmem>>, vector<1x32xf32>
    %55 = vector.broadcast %54 : vector<1x32xf32> to vector<12x32xf32>
    %56 = arith.mulf %43, %55 : vector<12x32xf32>
    %57 = tpu.concatenate %43, %48, %53, %56 in 1 : vector<12x32xf32>, vector<12x96xf32>, vector<12x32xf32>, vector<12x32xf32> -> vector<12x192xf32>
    %c0_46 = arith.constant 0 : index
    %c0_47 = arith.constant 0 : index
    %58 = vector.load %arg17[%c0_46, %c0_47] : memref<12x192xf32, #tpu.memory_space<vmem>>, vector<12x192xf32>
    tpu.vector_store %arg17[%c0_46, %c0_47], %57 {strides = array<i32>} : memref<12x192xf32, #tpu.memory_space<vmem>>, vector<12x192xf32>,
    %59 = tpu.concatenate %46, %50 in 1 : vector<16x32xf32>, vector<16x32xf32> -> vector<16x64xf32>
    %c0_48 = arith.constant 0 : index
    %c0_49 = arith.constant 0 : index
    %60 = vector.load %arg18[%c0_48, %c0_49] : memref<16x64xf32, #tpu.memory_space<vmem>>, vector<16x64xf32>
    tpu.vector_store %arg18[%c0_48, %c0_49], %59 {strides = array<i32>} : memref<16x64xf32, #tpu.memory_space<vmem>>, vector<16x64xf32>,
    return
  }
}

module attributes {stable_mosaic.version = 11 : i64} {
  func.func @_decoder_kernel(%arg0: memref<32x128xf32, #tpu.memory_space<vmem>>, %arg1: memref<32x128xf32, #tpu.memory_space<vmem>>, %arg2: memref<1x128xf32, #tpu.memory_space<vmem>>) attributes {dimension_semantics = [], scalar_prefetch = 0 : i64, scratch_operands = 0 : i64, tpu.core_type = #tpu.core_type<tc>} {
    %c0 = arith.constant 0 : index
    %c0_0 = arith.constant 0 : index
    %0 = vector.load %arg0[%c0, %c0_0] : memref<32x128xf32, #tpu.memory_space<vmem>>, vector<32x128xf32>
    %c0_1 = arith.constant 0 : index
    %c0_2 = arith.constant 0 : index
    %1 = vector.load %arg1[%c0_1, %c0_2] : memref<32x128xf32, #tpu.memory_space<vmem>>, vector<32x128xf32>
    %2 = arith.mulf %0, %1 : vector<32x128xf32>
    %cst = arith.constant dense<0.000000e+00> : vector<128xf32>
    %3 = vector.multi_reduction <add>, %2, %cst [0] : vector<32x128xf32> to vector<128xf32>
    %4 = vector.shape_cast %3 : vector<128xf32> to vector<1x128xf32>
    %c0_3 = arith.constant 0 : index
    %c0_4 = arith.constant 0 : index
    %5 = vector.load %arg2[%c0_3, %c0_4] : memref<1x128xf32, #tpu.memory_space<vmem>>, vector<1x128xf32>
    tpu.vector_store %arg2[%c0_3, %c0_4], %4 {strides = array<i32>} : memref<1x128xf32, #tpu.memory_space<vmem>>, vector<1x128xf32>,
    return
  }
}

</mosaic_0001>

<bundles_post_ra>
// kernel: link_predictor_forward.3
= control target key start
LH: loop header
LB: loop body
LE: loop exit
PB: predicated region body
PF: predicated region fallthrough
CT: control target
= control target key end

     0   :  { %s79_s0 = inlined_call_operand.vmem [shape: f32[32,128], index: 0, kind: input, shape index: {}]   ;;  %s80_s1 = inlined_call_operand.vmem [shape: f32[32,128], index: 1, kind: input, shape index: {}]   ;;  %s81_s2 = inlined_call_operand.vmem [shape: f32[1,128], index: 2, kind: output, shape index: {}]  }
   0x1   :  { %v11_v0 = vld [vmem:[%s79_s0] sm:$0xff]  ;;  %v12_v1 = vld [vmem:[%s79_s0 + $0x8] sm:$0xff]  ;;  %v13_v2 = vld [vmem:[%s79_s0 + $0x10] sm:$0xff] }
   0x2   :  { %v14_v3 = vld [vmem:[%s79_s0 + $0x18] sm:$0xff]  ;;  %v15_v4 = vld [vmem:[%s80_s1] sm:$0xff]  ;;  %v16_v5 = vld [vmem:[%s80_s1 + $0x8] sm:$0xff] }
   0x3   :  { %v17_v6 = vld [vmem:[%s80_s1 + $0x10] sm:$0xff]  ;;  %v18_v7 = vld [vmem:[%s80_s1 + $0x18] sm:$0xff]  ;;  %v19_v8 = vmul.f32 %v15_v4, %v11_v0  ;;  %v20_v9 = vmul.f32 %v16_v5, %v12_v1 }
   0x4   :  { %v21_v10 = vmul.f32 %v17_v6, %v13_v2  ;;  %v22_v11 = vmul.f32 %v18_v7, %v14_v3 }
   0x5   :  { %v23_v12 = vadd.f32 %v20_v9, %v19_v8 }
   0x7   :  { %v24_v13 = vadd.f32 %v23_v12, %v21_v10 }
   0x9   :  { %v25_v14 = vadd.f32 %v24_v13, %v22_v11 }
   0xb   :  { %v26_v15 = vrot.slane %v25_v14, 4 }
   0xd   :  { %v27_v16 = vadd.f32 %v26_v15, %v25_v14 }
   0xf   :  { %v28_v17 = vrot.slane %v27_v16, 2 }
  0x11   :  { %v29_v18 = vadd.f32 %v28_v17, %v27_v16 }
  0x13   :  { %v30_v19 = vrot.slane %v29_v18, 1 }
  0x15   :  { %v31_v20 = vadd.f32 %v30_v19, %v29_v18 }
  0x17   :  { %32 = vst [vmem:[%s81_s2] sm:$0x1] %v31_v20 }

// kernel: link_predictor_forward.2
= control target key start
LH: loop header
LB: loop body
LE: loop exit
PB: predicated region body
PF: predicated region fallthrough
CT: control target
= control target key end

     0   :  { %vm69_vm0 = vcmask 195584   ;;  %vm107_vm1 = vcmask 261120   ;;  %vm185_vm2 = vcmask 1043456   ;;  %vm178_vm3 = vcmask 97280   ;;  %s885_s2 = inlined_call_operand.vmem [shape: f32[24,32], index: 2, kind: input, shape index: {}]   ;;  %s886_s1 = inlined_call_operand.vmem [shape: f32[16,24], index: 1, kind: input, shape index: {}]   ;;  %s887_s6 = inlined_call_operand.vmem [shape: f32[32,96], index: 6, kind: input, shape index: {}]   ;;  %s888_s4 = inlined_call_operand.vmem [shape: f32[32,128], index: 4, kind: input, shape index: {}]   ;;  %s889_s3 = inlined_call_operand.vmem [shape: f32[1,32], index: 3, kind: input, shape index: {}]   ;;  %s890_s0 = inlined_call_operand.vmem [shape: f32[12,32], index: 0, kind: input, shape index: {}]   ;;  %s891_s5 = inlined_call_operand.vmem [shape: f32[1,128], index: 5, kind: input, shape index: {}]   ;;  %s892_s7 = inlined_call_operand.vmem [shape: f32[1,96], index: 7, kind: input, shape index: {}]   ;;  %s893_s9 = inlined_call_operand.vmem [shape: f32[16,12], index: 9, kind: input, shape index: {}]   ;;  %s894_s8 = inlined_call_operand.vmem [shape: f32[16,16], index: 8, kind: input, shape index: {}]   ;;  %s895_s12 = inlined_call_operand.vmem [shape: f32[12,12], index: 12, kind: input, shape index: {}]   ;;  %s896_s11 = inlined_call_operand.vmem [shape: f32[12,12], index: 11, kind: input, shape index: {}]   ;;  %s897_s10 = inlined_call_operand.vmem [shape: f32[12,16], index: 10, kind: input, shape index: {}]   ;;  %s898_s15 = inlined_call_operand.vmem [shape: f32[1,32], index: 15, kind: input, shape index: {}]   ;;  %s899_s16 = inlined_call_operand.vmem [shape: f32[1,32], index: 16, kind: input, shape index: {}]   ;;  %s900_s14 = inlined_call_operand.vmem [shape: f32[32,32], index: 14, kind: input, shape index: {}]   ;;  %s901_s13 = inlined_call_operand.vmem [shape: f32[32,96], index: 13, kind: input, shape index: {}]   ;;  %s902_s17 = inlined_call_operand.vmem [shape: f32[12,192], index: 17, kind: output, shape index: {0}]   ;;  %s903_s18 = inlined_call_operand.vmem [shape: f32[16,64], index: 18, kind: output, shape index: {1}]  }
   0x1   :  { %907 = sst [smem:[#allocation2_spill]] %s885_s2  ;;  %v102_v6 = vld [vmem:[%s888_s4 + $0x18] sm:$0xff]  ;;  %v101_v8 = vld [vmem:[%s888_s4 + $0x10] sm:$0xff]  ;;  %v100_v9 = vld [vmem:[%s888_s4 + $0x8] sm:$0xff]  ;;  %vm212_vm4 = vcmask 130048   ;;  %vm512_vm5 = vcmask 519168  }
   0x2   :  { %908 = sst [smem:[#allocation3_spill]] %s886_s1  ;;  %v99_v10 = vld [vmem:[%s888_s4] sm:$0xff]  ;;  %v59_v12 = vld [vmem:[%s890_s0 + $0x8] sm:$0xf]  ;;  %vm509_vm6 = vcmask 523264  }
   0x3   :  { %909 = sst [smem:[#allocation4_spill]] %s887_s6  ;;  %v58_v11 = vld [vmem:[%s890_s0] sm:$0xff]  ;;  %v177_v25 = vld [vmem:[%s893_s9 + $0x8] sm:$0xff]  ;;  %s579_s6 = smov 32  }
   0x4   :  { %s910_s29 = sld [smem:[#allocation2_spill]]  ;;  %v572_v15 = vld [vmem:[%s889_s3] ss:$0 sm:$0xff]  ;;  %s577_s3 = smov 64   ;;  %v175_v36 = vld [vmem:[%s894_s8 + $0x8] sm:$0xff] }
   0x5   :  { %s911_s22 = sld [smem:[#allocation3_spill]]  ;;  %v573_v21 = vld [vmem:[%s891_s5] ss:$0 sm:$0xff]  ;;  %v323_v39 = vld [vmem:[%s895_s12 + $0x8] sm:$0xf] }
   0x6   :  { %s912_s26 = sld [smem:[#allocation4_spill]]  ;;  %v176_v26 = vld [vmem:[%s893_s9] sm:$0xff]  ;;  %v247_v47 = vld [vmem:[%s896_s11 + $0x8] sm:$0xf] }
   0x7   :  { %v574_v27 = vld [vmem:[%s892_s7] ss:$0 sm:$0xff]  ;;  %v245_v48 = vld [vmem:[%s897_s10 + $0x8] sm:$0xf] }
   0x8   :  { %v174_v33 = vld [vmem:[%s894_s8] sm:$0xff] }
   0x9   :  { %v322_v38 = vld [vmem:[%s895_s12] sm:$0xff] }
   0xa   :  { %v64_v0 = vld [vmem:[%s910_s29 + $0x10] sm:$0xff]  ;;  %v63_v1 = vld [vmem:[%s910_s29 + $0x8] sm:$0xff]  ;;  %v62_v2 = vld [vmem:[%s910_s29] sm:$0xff] }
   0xb   :  { %89 = vmatpush.msra.mxu0 %v64_v0  ;;  %559 = vmatpush.msra.mxu1 %v64_v0  ;;  %v60_v3 = vld [vmem:[%s911_s22] sm:$0xff]  ;;  %v61_v4 = vld [vmem:[%s911_s22 + $0x8] sm:$0xff] }
   0xc   :  { %v140_v5 = vld [vmem:[%s912_s26 + $0x18] sm:$0xff]  ;;  %v139_v7 = vld [vmem:[%s912_s26 + $0x10] sm:$0xff]  ;;  %v138_v13 = vld [vmem:[%s912_s26 + $0x8] sm:$0xff] }
   0xd   :  { %90 = vmatpush.msra.mxu0 %v63_v1  ;;  %560 = vmatpush.msra.mxu1 %v63_v1  ;;  %v137_v14 = vld [vmem:[%s912_s26] sm:$0xff]  ;;  %s578_s26 = smov 96  }
   0xe   :  { %163 = vmatpush.msra.mxu2 %v140_v5  ;;  %v246_v43 = vld [vmem:[%s896_s11] sm:$0xff] }
   0xf   :  { %91 = vmatpush.msra.mxu0 %v62_v2  ;;  %561 = vmatpush.msra.mxu1 %v62_v2  ;;  %v244_v44 = vld [vmem:[%s897_s10] sm:$0xff] }
  0x10   :  { %536 = vmatmul.msk.f32.vlgmr.msra.gmra.mxu0 %vm69_vm0, %v60_v3  ;;  %537 = vmatmul.msk.f32.vlgmr.msra.gmra.mxu1 %vm69_vm0, %v61_v4 }
  0x11   :  { %126 = vmatpush.msrb.mxu1 %v102_v6  ;;  %164 = vmatpush.msra.mxu2 %v139_v7  ;;  %v575_v7 = vld [vmem:[%s898_s15] ss:$0 sm:$0xff] }
  0x13   :  { %127 = vmatpush.msrb.mxu1 %v101_v8  ;;  %165 = vmatpush.msra.mxu2 %v138_v13  ;;  %v426_v13 = vld [vmem:[%s900_s14 + $0x8] sm:$0xff] }
  0x15   :  { %128 = vmatpush.msrb.mxu1 %v100_v9  ;;  %166 = vmatpush.msra.mxu2 %v137_v14  ;;  %v425_v14 = vld [vmem:[%s900_s14] sm:$0xff] }
  0x17   :  { %129 = vmatpush.msrb.mxu1 %v99_v10  ;;  %v428_v10 = vld [vmem:[%s900_s14 + $0x18] sm:$0xff] }
  0x18   :  { %538 = vmatmul.msk.f32.vlgmr.msrb.gmra.mxu1 %vm107_vm1, %v58_v11 }
  0x20   :  { %539 = vmatmul.msk.f32.gmra.mxu1 %vm107_vm1, %v59_v12  ;;  %v427_v12 = vld [vmem:[%s900_s14 + $0x10] sm:$0xff] }
  0x8d   :  { %v93_v16 = vpop.f32.mrf.mxu0  ;;  %v96_v17 = vpop.f32.mrf.mxu1 }
  0x8e   :  { %v94_v18 = vadd.f32 %v572_v15, %v93_v16  ;;  %v97_v19 = vadd.f32 %v572_v15, %v96_v17 }
  0x90   :  { %540 = vmatmul.msk.f32.vlgmr.msra.gmra.mxu2 %vm107_vm1, %v94_v18  ;;  %v391_v18 = vld [vmem:[%s901_s13 + $0x18] sm:$0xff] }
  0x95   :  { %v131_v20 = vpop.f32.mrf.mxu1 }
  0x96   :  { %v730_v23 = vadd.f32 %v573_v21, %v131_v20  ;;  %v389_v20 = vld [vmem:[%s901_s13 + $0x8] sm:$0xff] }
  0x98   :  { %541 = vmatmul.msk.f32.gmra.mxu2 %vm107_vm1, %v97_v19  ;;  %v390_v19 = vld [vmem:[%s901_s13 + $0x10] sm:$0xff] }
  0x9d   :  { %v134_v22 = vpop.f32.mrf.mxu1 }
  0x9e   :  { %v732_v24 = vadd.f32 %v573_v21, %v134_v22  ;;  %v388_v21 = vld [vmem:[%s901_s13] sm:$0xff] }
  0xa0   :  { %326 = vrot.lane.b32.xlu0 %v732_v24, %s577_s3  ;;  %542 = vmatpush.msk.msrb.mxu2 %vm185_vm2, %v732_v24 }
  0xa1   :  { %562 = vmatpush.msk.msra.mxu3 %vm185_vm2, %v732_v24  ;;  %251 = vrot.lane.b32.xlu1 %v732_v24, %s578_s26 }
  0xa2   :  { %204 = vmatpush.msrb.mxu2 %v730_v23 }
  0xa3   :  { %563 = vmatpush.msra.mxu3 %v730_v23  ;;  %543 = vmatmul.msk.f32.vlgmr.msrb.gmra.mxu2 %vm178_vm3, %v176_v26 }
  0xa4   :  { %544 = vmatmul.msk.f32.vlgmr.msra.gmra.mxu3 %vm178_vm3, %v177_v25 }
  0xa8   :  { %324 = vrot.lane.b32.xlu0 %v730_v23, %s577_s3 }
 0x112   :  { %v327_v34 = vpop.permute.xlu0 %326 }
 0x113   :  { %v168_v28 = vpop.f32.mrf.mxu2  ;;  %v252_v35 = vpop.permute.xlu1 %251  ;;  %552 = vmatpush.msk.msra.mxu2 %vm185_vm2, %v327_v34 }
 0x114   :  { %v757_v29 = vadd.f32 %v574_v27, %v168_v28  ;;  %547 = vmatpush.msk.msrb.mxu0 %vm185_vm2, %v252_v35 }
 0x116   :  { %287 = vrot.lane.b32.xlu2 %v757_v29, %s578_s26 }
 0x11a   :  { %v325_v37 = vpop.permute.xlu0 %324 }
 0x11b   :  { %v171_v30 = vpop.f32.mrf.mxu2  ;;  %352 = vmatpush.msra.mxu2 %v325_v37 }
 0x11c   :  { %v761_v31 = vadd.f32 %v574_v27, %v171_v30  ;;  %553 = vmatmul.msk.f32.vlgmr.msra.gmra.mxu2 %vm178_vm3, %v322_v38  ;;  %v576_v27 = vld [vmem:[%s899_s16] ss:$0 sm:$0xff] }
 0x11e   :  { %233 = vmatpush.msrb.mxu3 %v761_v31  ;;  %v567_v32 = vpack.i.bf16 %v730_v23, %v761_v31 }
 0x120   :  { %568 = vrot.lane.b32.xlu1 %v567_v32, %s578_s26  ;;  %234 = vmatpush.msrb.mxu3 %v757_v29 }
 0x121   :  { %545 = vmatmul.msk.f32.vlgmr.msrb.gmra.mxu3 %vm212_vm4, %v174_v33 }
 0x122   :  { %414 = vmatpush.msra.mxu3 %v391_v18 }
 0x124   :  { %554 = vmatmul.msk.f32.gmra.mxu2 %vm178_vm3, %v323_v39  ;;  %415 = vmatpush.msra.mxu3 %v390_v19 }
 0x126   :  { %v206_v49 = vpop.f32.mrf.mxu2  ;;  %416 = vmatpush.msra.mxu3 %v389_v20 }
 0x127   :  { %v209_v46 = vpop.f32.mrf.mxu3 }
 0x128   :  { %417 = vmatpush.msra.mxu3 %v388_v21 }
 0x129   :  { %546 = vmatmul.msk.f32.gmra.mxu3 %vm212_vm4, %v175_v36 }
 0x170   :  { %v288_v45 = vpop.permute.xlu2 %287 }
 0x192   :  { %v569_v40 = vpop.permute.xlu1 %568 }
 0x193   :  { %v570_v41 = vunpack.i.l.bf16 %v569_v40  ;;  %v571_v42 = vunpack.i.h.bf16 %v569_v40 }
 0x195   :  { %277 = vmatpush.msrb.mxu0 %v571_v42  ;;  %313 = vmatpush.msra.mxu1 %v570_v41 }
 0x196   :  { %548 = vmatmul.msk.f32.vlgmr.msrb.gmra.mxu0 %vm178_vm3, %v246_v43 }
 0x197   :  { %314 = vmatpush.msra.mxu1 %v288_v45  ;;  %451 = vmatpush.msra.mxu0 %v428_v10 }
 0x198   :  { %550 = vmatmul.msk.f32.vlgmr.msra.gmra.mxu1 %vm212_vm4, %v244_v44 }
 0x199   :  { %452 = vmatpush.msra.mxu0 %v427_v12 }
 0x19b   :  { %453 = vmatpush.msra.mxu0 %v426_v13 }
 0x19d   :  { %454 = vmatpush.msra.mxu0 %v425_v14 }
 0x19e   :  { %549 = vmatmul.msk.f32.gmra.mxu0 %vm178_vm3, %v247_v47 }
 0x19f   :  { %v354_v54 = vpop.f32.mrf.mxu2 }
 0x1a0   :  { %551 = vmatmul.msk.f32.gmra.mxu1 %vm212_vm4, %v245_v48 }
 0x1a4   :  { %v236_v50 = vpop.f32.mrf.mxu3 }
 0x1a5   :  { %v237_v51 = vadd.f32 %v236_v50, %v206_v49 }
 0x1a7   :  { %v242_v52 = vmul.f32 0.5, %v237_v51  ;;  %v357_v62 = vpop.f32.mrf.mxu2 }
 0x1a9   :  { %378 = vrot.lane.b32.xlu0 %v242_v52, %s577_s3 }
 0x1ac   :  { %v239_v59 = vpop.f32.mrf.mxu3 }
 0x1ad   :  { %v240_v63 = vadd.f32 %v239_v59, %v209_v46 }
 0x1af   :  { %v243_v2 = vmul.f32 0.5, %v240_v63 }
 0x213   :  { %v279_v53 = vpop.f32.mrf.mxu0 }
 0x215   :  { %v316_v55 = vpop.f32.mrf.mxu1 }
 0x216   :  { %v317_v56 = vadd.f32 %v316_v55, %v279_v53 }
 0x218   :  { %v360_v57 = vadd.f32 %v354_v54, %v317_v56 }
 0x21a   :  { %v362_v58 = vmul.f32 0.33333334, %v360_v57 }
 0x21b   :  { %v282_v60 = vpop.f32.mrf.mxu0  ;;  %v379_v4 = vpop.permute.xlu0 %378 }
 0x21c   :  { %366 = vrot.lane.b32.xlu2 %v362_v58, %s578_s26  ;;  %v384_v5 = vadd.f32 %v379_v4, %v757_v29 }
 0x21d   :  { %v319_v61 = vpop.f32.mrf.mxu1 }
 0x21e   :  { %v320_v0 = vadd.f32 %v319_v61, %v282_v60  ;;  %v386_v6 = vmax.f32 %v384_v5, 0.0 }
 0x220   :  { %v361_v1 = vadd.f32 %v357_v62, %v320_v0 }
 0x222   :  { %v363_v3 = vmul.f32 0.33333334, %v361_v1 }
 0x224   :  { %380 = vrot.lane.b32.xlu2 %v243_v2, %s577_s3  ;;  %368 = vrot.lane.b32.xlu1 %v363_v3, %s578_s26 }
 0x22c   :  { %431 = vrot.lane.b32.xlu1 %v386_v6, %s577_s3 }
 0x234   :  { %465 = vrot.lane.b32.xlu1 %v575_v7, %s578_s26 }
 0x276   :  { %v367_v8 = vpop.permute.xlu2 %366 }
 0x277   :  { %v372_v9 = vadd.f32 %v367_v8, %v730_v23 }
 0x279   :  { %v374_v11 = vmax.f32 %v372_v9, 0.0 }
 0x27b   :  { %394 = vrot.lane.b32.xlu0 %v374_v11, %s579_s6 }
 0x27e   :  { %v381_v15 = vpop.permute.xlu2 %380 }
 0x27f   :  { %v385_v16 = vadd.f32 %v381_v15, %v761_v31 }
 0x281   :  { %v387_v17 = vmax.f32 %v385_v16, 0.0 }
 0x283   :  { %433 = vrot.lane.b32.xlu0 %v387_v17, %s577_s3 }
 0x296   :  { %v369_v22 = vpop.permute.xlu1 %368 }
 0x297   :  { %v373_v23 = vadd.f32 %v369_v22, %v732_v24 }
 0x299   :  { %v375_v25 = vmax.f32 %v373_v23, 0.0 }
 0x29b   :  { %396 = vrot.lane.b32.xlu2 %v375_v25, %s579_s6 }
 0x29e   :  { %v432_v26 = vpop.permute.xlu1 %431 }
 0x29f   :  { %557 = vmatmul.msk.f32.vlgmr.msra.gmra.mxu0 %vm107_vm1, %v432_v26 }
 0x2a3   :  { %473 = vrot.lane.b32.xlu2 %v576_v27, %s578_s26 }
 0x2a6   :  { %v466_v28 = vpop.permute.xlu1 %465 }
 0x2a7   :  { %v469_v29 = vmul.f32 %v466_v28, %v375_v25  ;;  %v468_v30 = vmul.f32 %v466_v28, %v374_v11 }
 0x2a9   :  { %492 = vrot.lane.b32.xlu0 %v469_v29, %s579_s6 }
 0x2ab   :  { %490 = vrot.lane.b32.xlu2 %v468_v30, %s579_s6 }
 0x2ed   :  { %v395_v24 = vpop.permute.xlu0 %394 }
 0x2ee   :  { %555 = vmatmul.msk.f32.vlgmr.msra.gmra.mxu3 %vm107_vm1, %v395_v24 }
 0x2f5   :  { %v397_v31 = vpop.permute.xlu2 %396  ;;  %v434_v32 = vpop.permute.xlu0 %433 }
 0x2f6   :  { %556 = vmatmul.msk.f32.gmra.mxu3 %vm107_vm1, %v397_v31  ;;  %558 = vmatmul.msk.f32.gmra.mxu0 %vm107_vm1, %v434_v32 }
 0x2fd   :  { %v474_v33 = vpop.permute.xlu2 %473 }
 0x2fe   :  { %v476_v34 = vmul.f32 %v474_v33, %v374_v11  ;;  %v477_v35 = vmul.f32 %v474_v33, %v375_v25 }
 0x300   :  { %498 = vrot.lane.b32.xlu1 %v476_v34, %s577_s3  ;;  %500 = vrot.lane.b32.xlu2 %v477_v35, %s577_s3 }
 0x305   :  { %v491_v36 = vpop.permute.xlu2 %490 }
 0x31b   :  { %v493_v37 = vpop.permute.xlu0 %492 }
 0x31c   :  { %v456_v43 = vpop.f32.mrf.mxu0 }
 0x35a   :  { %v501_v38 = vpop.permute.xlu2 %500 }
 0x35b   :  { %v507_v39 = vsel %vm107_vm1, %v493_v37, %v501_v38 }
 0x35c   :  { %513 = vst.msk [vmem:[%s902_s17 + $0x18] sm:$0xf] %vm512_vm5, %v507_v39 }
 0x371   :  { %v419_v40 = vpop.f32.mrf.mxu3 }
 0x372   :  { %v499_v41 = vpop.permute.xlu1 %498  ;;  %482 = vrot.lane.b32.xlu0 %v419_v40, %s579_s6 }
 0x373   :  { %v506_v42 = vsel %vm107_vm1, %v491_v36, %v499_v41  ;;  %v459_v45 = vpop.f32.mrf.mxu0 }
 0x374   :  { %510 = vst.msk [vmem:[%s902_s17 + $0x8] sm:$0xff] %vm509_vm6, %v506_v42 }
 0x379   :  { %v422_v44 = vpop.f32.mrf.mxu3 }
 0x37a   :  { %518 = vrot.lane.b32.xlu0 %v456_v43, %s579_s6  ;;  %484 = vrot.lane.b32.xlu1 %v422_v44, %s579_s6 }
 0x382   :  { %520 = vrot.lane.b32.xlu1 %v459_v45, %s579_s6 }
 0x3e4   :  { %v483_v46 = vpop.permute.xlu0 %482 }
 0x3e5   :  { %v504_v47 = vsel %vm107_vm1, %v395_v24, %v483_v46 }
 0x3e6   :  { %508 = vst [vmem:[%s902_s17] sm:$0xff] %v504_v47 }
 0x3ec   :  { %v485_v48 = vpop.permute.xlu1 %484  ;;  %v519_v49 = vpop.permute.xlu0 %518 }
 0x3ed   :  { %v505_v50 = vsel %vm107_vm1, %v397_v31, %v485_v48  ;;  %v524_v51 = vsel %vm107_vm1, %v432_v26, %v519_v49 }
 0x3ee   :  { %511 = vst [vmem:[%s902_s17 + $0x10] sm:$0xf] %v505_v50 }
 0x3ef   :  { %526 = vst.msk [vmem:[%s903_s18] sm:$0xff] %vm509_vm6, %v524_v51 }
 0x3f4   :  { %v521_v52 = vpop.permute.xlu1 %520 }
 0x3f5   :  { %v525_v53 = vsel %vm107_vm1, %v434_v32, %v521_v52 }
 0x3f6   :  { %527 = vst.msk [vmem:[%s903_s18 + $0x8] sm:$0xff] %vm509_vm6, %v525_v53 }

</bundles_post_ra>
